<compile_context>
chip_gen: v7x
topology: tpu7x:2x2x1
jax: 0.10.0
libtpu: 0.0.40
codegen_flags: <defaults>
</compile_context>

<pallas_src>
import jax
import jax.numpy as jnp
from jax.experimental import pallas as pl
from jax.experimental.pallas import tpu as pltpu

LEAKY_SLOPE = 0.1
BN_EPS = 1e-5
LANES = 128


def _round_up(x, m):
    return -(-x // m) * m


def _vmem_budget_bytes():
    """~75% of physical VMEM (generation-aware); conservative 64 MiB fallback."""
    cap = None
    try:
        info = pltpu.get_tpu_info()
        cap = getattr(info, "vmem_capacity_bytes", None)
    except Exception:
        cap = None
    if not cap:
        cap = 64 * 1024 * 1024  # v7x-safe assumption
    return max(32 * 1024 * 1024, int(cap) * 3 // 4)


def _matmul_scale_bias_lrelu_kernel(a_ref, w_ref, s_ref, b_ref, o_ref):
    # a_ref: (TM, K)      bf16 im2col patches (streamed)
    # w_ref: (K, Cout_p)  bf16 unscaled conv weight (VMEM-resident)
    # s_ref: (1, Cout_p)  f32 folded BN scale
    # b_ref: (1, Cout_p)  f32 folded BN bias
    acc = jnp.dot(a_ref[...], w_ref[...], preferred_element_type=jnp.float32)
    y = acc * s_ref[...] + b_ref[...]
    o_ref[...] = jnp.maximum(y, LEAKY_SLOPE * y).astype(o_ref.dtype)


def _matmul_scale_bias_lrelu_ktiled_kernel(a_ref, w_ref, s_ref, b_ref, o_ref,
                                           acc_ref):
    # Fallback for weights too large to keep VMEM-resident: K-tiled accumulate.
    @pl.when(pl.program_id(2) == 0)
    def _():
        acc_ref[...] = jnp.zeros_like(acc_ref)

    acc_ref[...] += jnp.dot(a_ref[...], w_ref[...],
                            preferred_element_type=jnp.float32)

    @pl.when(pl.program_id(2) == pl.num_programs(2) - 1)
    def _():
        y = acc_ref[...] * s_ref[...] + b_ref[...]
        o_ref[...] = jnp.maximum(y, LEAKY_SLOPE * y).astype(o_ref.dtype)


def init_downsampling_params(key, in_channels, out_channels,
                             compute_dtype=jnp.bfloat16):
    """Synthetic conv + BN params; BN folded to (scale, bias); Cout lane-padded."""
    k_w, k_g, k_b, k_m, k_v = jax.random.split(key, 5)
    # Conv weight in HWIO layout (equivalent to PyTorch OIHW, transposed).
    w_hwio = 0.1 * jax.random.normal(
        k_w, (3, 3, in_channels, out_channels), jnp.float32)
    gamma = 1.0 + 0.1 * jax.random.normal(k_g, (out_channels,), jnp.float32)
    beta = 0.1 * jax.random.normal(k_b, (out_channels,), jnp.float32)
    running_mean = 0.1 * jax.random.normal(k_m, (out_channels,), jnp.float32)
    running_var = jax.random.uniform(k_v, (out_channels,), jnp.float32, 0.5, 1.5)

    # Fold BN (eval mode) into a per-channel affine; applied in the f32 epilogue.
    scale = gamma / jnp.sqrt(running_var + BN_EPS)
    bias = beta - running_mean * scale

    cout_p = _round_up(out_channels, LANES)  # lane-dense Cout
    pad_c = cout_p - out_channels
    # Weight kept UNSCALED in bf16 (better precision than folding scale in).
    w_pad = jnp.pad(w_hwio, ((0, 0), (0, 0), (0, 0), (0, pad_c)))
    # (3,3,Cin,Cout_p) -> (9*Cin, Cout_p); row order dy-major/dx/ci matches the
    # im2col concat order in the wrapper.
    w_mat = w_pad.reshape(9 * in_channels, cout_p).astype(compute_dtype)
    scale_row = jnp.pad(scale, (0, pad_c)).reshape(1, cout_p).astype(jnp.float32)
    bias_row = jnp.pad(bias, (0, pad_c)).reshape(1, cout_p).astype(jnp.float32)
    return {
        "w_mat": w_mat,
        "scale_row": scale_row,
        "bias_row": bias_row,
        "out_channels": out_channels,
        "cout_padded": cout_p,
        # raw pieces kept only for the pure-JAX reference check in __main__
        "w_hwio": w_hwio,
        "bn_scale": scale,
        "bn_bias": bias,
    }


def _select_resident_tm(m, k_dim, cout_p, out_itemsize, budget):
    """Largest M tile that fits when the whole weight stays VMEM-resident."""
    w_bytes = 2 * k_dim * cout_p * 2          # weight, conservatively 2 buffers
    if w_bytes > budget // 2:
        return None                           # weight too big to keep resident
    tm_cap = max(16, _round_up(m, 16))        # bf16 sublane packing
    cands = sorted({min(tm_cap, 1024)} |
                   {c for c in (512, 256, 128, 64, 32, 16) if c <= tm_cap},
                   reverse=True)
    for tm in cands:
        step = (2 * tm * k_dim * 2            # patches, double-buffered
                + w_bytes                     # resident weight
                + 2 * tm * cout_p * out_itemsize   # output, double-buffered
                + 4 * cout_p * 4)             # scale + bias rows
        if step <= budget:
            return tm
    return None


def _select_fallback_tiles(m, k_dim, cout_p, out_itemsize, budget):
    """(tm, tn, tk) for the K-tiled path when the weight cannot stay resident."""
    tn = 256 if cout_p % 256 == 0 else 128
    tm = min(512, max(16, _round_up(m, 16)))
    tk_full = _round_up(k_dim, 128)
    for tk in [tk_full] + [t for t in (2048, 1024, 512, 256, 128) if t < tk_full]:
        step = (2 * tm * tk * 2 + 2 * tk * tn * 2
                + 2 * tm * tn * out_itemsize + tm * tn * 4 + 4 * tn * 4)
        if step <= budget:
            return tm, tn, tk
    return tm, tn, 128


def downsampling_layer_forward(x_nchw, params, *, compute_dtype=jnp.bfloat16,
                               out_dtype=jnp.float32, output_layout="NCHW"):
    """Forward of DownsamplingLayer. Input NCHW; output NCHW (or NHWC)."""
    n, cin, h, w = x_nchw.shape
    ho = (h - 1) // 2 + 1
    wo = (w - 1) // 2 + 1
    cout = params["out_channels"]
    cout_p = params["cout_padded"]
    w_mat = params["w_mat"].astype(compute_dtype)
    scale_row = params["scale_row"]
    bias_row = params["bias_row"]
    k_dim = 9 * cin

    # NCHW -> NHWC (channels on the 128-lane axis); cast to bf16 BEFORE im2col
    # so the materialized patches buffer is 2 bytes/elem.
    x = jnp.transpose(x_nchw, (0, 2, 3, 1)).astype(compute_dtype)

    # im2col for the stride-2 / pad-1 3x3 conv: 9 contiguous strided slices of
    # the spatially padded input, concatenated along channels (pure layout ops,
    # fused by XLA).  Row order (dy-major, dx, ci) matches w_mat's reshape.
    xp = jnp.pad(x, ((0, 0), (1, 1), (1, 1), (0, 0)))
    cols = [xp[:, dy:dy + 2 * ho - 1:2, dx:dx + 2 * wo - 1:2, :]
            for dy in range(3) for dx in range(3)]
    patches = jnp.concatenate(cols, axis=-1).reshape(n * ho * wo, k_dim)

    m = n * ho * wo
    budget = _vmem_budget_bytes()
    out_itemsize = jnp.dtype(out_dtype).itemsize
    tm = _select_resident_tm(m, k_dim, cout_p, out_itemsize, budget)

    if tm is not None:
        # ---- Main path: weight/scale/bias VMEM-resident, 1-D grid over M.
        m_pad = _round_up(m, tm)
        if m_pad != m:
            patches = jnp.pad(patches, ((0, m_pad - m), (0, 0)))
        cost = pl.CostEstimate(
            flops=2 * m_pad * k_dim * cout_p,
            transcendentals=0,
            bytes_accessed=(m_pad * k_dim * 2 + k_dim * cout_p * 2
                            + 2 * cout_p * 4 + m_pad * cout_p * out_itemsize))
        out = pl.pallas_call(
            _matmul_scale_bias_lrelu_kernel,
            out_shape=jax.ShapeDtypeStruct((m_pad, cout_p), out_dtype),
            grid_spec=pltpu.PrefetchScalarGridSpec(
                num_scalar_prefetch=0,
                grid=(m_pad // tm,),
                in_specs=[
                    pl.BlockSpec((tm, k_dim), lambda i: (i, 0)),      # patches
                    pl.BlockSpec((k_dim, cout_p), lambda i: (0, 0)),  # weight
                    pl.BlockSpec((1, cout_p), lambda i: (0, 0)),      # scale
                    pl.BlockSpec((1, cout_p), lambda i: (0, 0)),      # bias
                ],
                out_specs=pl.BlockSpec((tm, cout_p), lambda i: (i, 0)),
            ),
            compiler_params=pltpu.CompilerParams(
                dimension_semantics=("parallel",),
                vmem_limit_bytes=budget),
            cost_estimate=cost,
        )(patches, w_mat, scale_row, bias_row)
    else:
        # ---- Fallback: weight too large to keep resident -> tile N and K.
        tm, tn, tk = _select_fallback_tiles(m, k_dim, cout_p, out_itemsize,
                                            budget)
        k_pad = _round_up(k_dim, tk)
        if k_pad != k_dim:
            patches = jnp.pad(patches, ((0, 0), (0, k_pad - k_dim)))
            w_mat = jnp.pad(w_mat, ((0, k_pad - k_dim), (0, 0)))
        m_pad = _round_up(m, tm)
        if m_pad != m:
            patches = jnp.pad(patches, ((0, m_pad - m), (0, 0)))
        cost = pl.CostEstimate(
            flops=2 * m_pad * k_pad * cout_p,
            transcendentals=0,
            bytes_accessed=((m_pad // tm) * k_pad * cout_p * 2
                            + (cout_p // tn) * m_pad * k_pad * 2
                            + 2 * cout_p * 4 + m_pad * cout_p * out_itemsize))
        out = pl.pallas_call(
            _matmul_scale_bias_lrelu_ktiled_kernel,
            out_shape=jax.ShapeDtypeStruct((m_pad, cout_p), out_dtype),
            grid_spec=pltpu.PrefetchScalarGridSpec(
                num_scalar_prefetch=0,
                grid=(m_pad // tm, cout_p // tn, k_pad // tk),
                in_specs=[
                    pl.BlockSpec((tm, tk), lambda i, j, k: (i, k)),
                    pl.BlockSpec((tk, tn), lambda i, j, k: (k, j)),
                    pl.BlockSpec((1, tn), lambda i, j, k: (0, j)),
                    pl.BlockSpec((1, tn), lambda i, j, k: (0, j)),
                ],
                out_specs=pl.BlockSpec((tm, tn), lambda i, j, k: (i, j)),
                scratch_shapes=[pltpu.VMEM((tm, tn), jnp.float32)],
            ),
            compiler_params=pltpu.CompilerParams(
                dimension_semantics=("parallel", "parallel", "arbitrary"),
                vmem_limit_bytes=budget),
            cost_estimate=cost,
        )(patches, w_mat, scale_row, bias_row)

    # Drop M / Cout padding.
    y = out[:m, :cout].reshape(n, ho, wo, cout)
    if output_layout == "NHWC":
        return y   # callers that consume NHWC skip an extra HBM transpose pass
    return jnp.transpose(y, (0, 3, 1, 2))


if __name__ == "__main__":
    in_channels, out_channels = 4, 8
    N, H, W = 2, 16, 16
    Ho, Wo = (H - 1) // 2 + 1, (W - 1) // 2 + 1

    key = jax.random.PRNGKey(0)
    key_x, key_p = jax.random.split(key)
    x = jax.random.normal(key_x, (N, in_channels, H, W), jnp.float32)

    params = init_downsampling_params(key_p, in_channels, out_channels)

    fwd = jax.jit(lambda xx: downsampling_layer_forward(xx, params))
    y = fwd(x)
    jax.block_until_ready(y)

    assert y.shape == (N, out_channels, Ho, Wo), y.shape
    assert bool(jnp.all(jnp.isfinite(y)))

    # Pure-JAX reference (f32 conv + eval-mode BN + LeakyReLU) for sanity.
    w_oihw = jnp.transpose(params["w_hwio"], (3, 2, 0, 1))
    ref = jax.lax.conv_general_dilated(
        x, w_oihw, window_strides=(2, 2), padding=((1, 1), (1, 1)),
        dimension_numbers=("NCHW", "OIHW", "NCHW"))
    ref = ref * params["bn_scale"][None, :, None, None] \
        + params["bn_bias"][None, :, None, None]
    ref = jnp.where(ref > 0, ref, LEAKY_SLOPE * ref)
    assert bool(jnp.allclose(y, ref, atol=5e-2, rtol=5e-2)), \
        float(jnp.max(jnp.abs(y - ref)))

    print("KERNEL_OK")
</pallas_src>

<mosaic_0001>
module attributes {stable_mosaic.version = 11 : i64} {
  func.func @_matmul_scale_bias_lrelu_kernel(%arg0: i32, %arg1: memref<128x36xbf16, #tpu.memory_space<vmem>>, %arg2: memref<36x128xbf16, #tpu.memory_space<vmem>>, %arg3: memref<1x128xf32, #tpu.memory_space<vmem>>, %arg4: memref<1x128xf32, #tpu.memory_space<vmem>>, %arg5: memref<128x128xf32, #tpu.memory_space<vmem>>) attributes {dimension_semantics = [#tpu.dimension_semantics<parallel>], iteration_bounds = array<i64: 1>, scalar_prefetch = 0 : i64, scratch_operands = 0 : i64, tpu.core_type = #tpu.core_type<tc>, window_params = [{transform_indices = @transform_0, window_bounds = array<i64: 128, 36>}, {pipeline_mode = #tpu.pipeline_mode<synchronous>, transform_indices = @transform_1, window_bounds = array<i64: 36, 128>}, {pipeline_mode = #tpu.pipeline_mode<synchronous>, transform_indices = @transform_2, window_bounds = array<i64: 1, 128>}, {pipeline_mode = #tpu.pipeline_mode<synchronous>, transform_indices = @transform_3, window_bounds = array<i64: 1, 128>}, {transform_indices = @transform_4, window_bounds = array<i64: 128, 128>}]} {
    %c0 = arith.constant 0 : index
    %c0_0 = arith.constant 0 : index
    %0 = vector.load %arg1[%c0, %c0_0] : memref<128x36xbf16, #tpu.memory_space<vmem>>, vector<128x36xbf16>
    %c0_1 = arith.constant 0 : index
    %c0_2 = arith.constant 0 : index
    %1 = vector.load %arg2[%c0_1, %c0_2] : memref<36x128xbf16, #tpu.memory_space<vmem>>, vector<36x128xbf16>
    %cst = arith.constant dense<0.000000e+00> : vector<128x128xf32>
    %2 = tpu.matmul %0, %1, %cst {dimension_numbers = #tpu.dot_dimension_numbers<[1], [0], [0], [1], [0, 0, 1, 1], [], []>} : vector<128x36xbf16>, vector<36x128xbf16>, vector<128x128xf32> -> vector<128x128xf32>
    %c0_3 = arith.constant 0 : index
    %c0_4 = arith.constant 0 : index
    %3 = vector.load %arg3[%c0_3, %c0_4] : memref<1x128xf32, #tpu.memory_space<vmem>>, vector<1x128xf32>
    %4 = vector.broadcast %3 : vector<1x128xf32> to vector<128x128xf32>
    %5 = arith.mulf %2, %4 : vector<128x128xf32>
    %c0_5 = arith.constant 0 : index
    %c0_6 = arith.constant 0 : index
    %6 = vector.load %arg4[%c0_5, %c0_6] : memref<1x128xf32, #tpu.memory_space<vmem>>, vector<1x128xf32>
    %7 = vector.broadcast %6 : vector<1x128xf32> to vector<128x128xf32>
    %8 = arith.addf %5, %7 : vector<128x128xf32>
    %cst_7 = arith.constant 1.000000e-01 : f32
    %9 = vector.broadcast %cst_7 : f32 to vector<128x128xf32>
    %10 = arith.mulf %9, %8 : vector<128x128xf32>
    %11 = arith.maximumf %8, %10 : vector<128x128xf32>
    %c0_8 = arith.constant 0 : index
    %c0_9 = arith.constant 0 : index
    %12 = vector.load %arg5[%c0_8, %c0_9] : memref<128x128xf32, #tpu.memory_space<vmem>>, vector<128x128xf32>
    tpu.vector_store %arg5[%c0_8, %c0_9], %11 {strides = array<i32>} : memref<128x128xf32, #tpu.memory_space<vmem>>, vector<128x128xf32>,
    return
  }
  func.func @transform_0(%arg0: i32) -> (i32, i32) {
    %c0_i32 = arith.constant 0 : i32
    %c0_i32_0 = arith.constant 0 : i32
    return %arg0, %c0_i32 : i32, i32
  }
  func.func @transform_1(%arg0: i32) -> (i32, i32) {
    %c0_i32 = arith.constant 0 : i32
    %c0_i32_0 = arith.constant 0 : i32
    %c0_i32_1 = arith.constant 0 : i32
    return %c0_i32, %c0_i32_0 : i32, i32
  }
  func.func @transform_2(%arg0: i32) -> (i32, i32) {
    %c0_i32 = arith.constant 0 : i32
    %c0_i32_0 = arith.constant 0 : i32
    %c0_i32_1 = arith.constant 0 : i32
    return %c0_i32, %c0_i32_0 : i32, i32
  }
  func.func @transform_3(%arg0: i32) -> (i32, i32) {
    %c0_i32 = arith.constant 0 : i32
    %c0_i32_0 = arith.constant 0 : i32
    %c0_i32_1 = arith.constant 0 : i32
    return %c0_i32, %c0_i32_0 : i32, i32
  }
  func.func @transform_4(%arg0: i32) -> (i32, i32) {
    %c0_i32 = arith.constant 0 : i32
    %c0_i32_0 = arith.constant 0 : i32
    return %arg0, %c0_i32 : i32, i32
  }
}

</mosaic_0001>

<bundles_post_ra>
// kernel: _lambda_.1
= control target key start
LH: loop header
LB: loop body
LE: loop exit
PB: predicated region body
PF: predicated region fallthrough
CT: control target
= control target key end

     0   :  { %vm94_vm0 = vcmask 293888   ;;  %vm119_vm1 = vcmask 1041408   ;;  %s547_s1 = inlined_call_operand.vmem [shape: bf16[36,128], index: 1, kind: input, shape index: {}]   ;;  %s548_s0 = inlined_call_operand.vmem [shape: bf16[128,36], index: 0, kind: input, shape index: {}]   ;;  %s549_s2 = inlined_call_operand.vmem [shape: f32[1,128], index: 2, kind: input, shape index: {}]   ;;  %s550_s3 = inlined_call_operand.vmem [shape: f32[1,128], index: 3, kind: input, shape index: {}]   ;;  %s551_s4 = inlined_call_operand.vmem [shape: f32[128,128], index: 4, kind: output, shape index: {}]  }
   0x1   :  { %v380_v0 = vld [vmem:[%s547_s1] sm:$0xff]   ;;  %v381_v1 = vld [vmem:[%s547_s1 + $0x8] sm:$0xff]   ;;  %v382_v2 = vld [vmem:[%s547_s1 + $0x10] ss:$0 sps:$4 sm:$0x33]  }
   0x2   :  { %350 = vmatprep.subr.bf16.mxu0 %v380_v0  ;;  %372 = vmatprep.subr.bf16.mxu1 %v380_v0  ;;  %v383_v3 = vld [vmem:[%s548_s0] sm:$0xff]   ;;  %v121_v5 = vsel %vm119_vm1, %v382_v2, 0  ;;  %v385_v6 = vld [vmem:[%s548_s0 + $0x8] sm:$0xff]   ;;  %v387_v8 = vld [vmem:[%s548_s0 + $0x10] sm:$0xff]  }
   0x3   :  { %351 = vmatpush3.bf16.msra.mxu0 %v380_v0  ;;  %375 = vmatpush3.bf16.msra.mxu1 %v380_v0  ;;  %v384_v4 = vld [vmem:[%s548_s0 + $0x20] sm:$0xff]   ;;  %v386_v7 = vld [vmem:[%s548_s0 + $0x28] sm:$0xff]   ;;  %v388_v9 = vld [vmem:[%s548_s0 + $0x30] sm:$0xff]  }
   0x4   :  { %352 = vmatprep.subr.bf16.mxu0 %v381_v1  ;;  %373 = vmatprep.subr.bf16.mxu1 %v381_v1  ;;  %v389_v10 = vld [vmem:[%s548_s0 + $0x18] sm:$0xff]   ;;  %v460_v12 = vld [vmem:[%s549_s2] ss:$0 sm:$0xff] }
   0x5   :  { %356 = vmatprep.mubr.msk.bf16.mxu0 %vm94_vm0, %v383_v3  ;;  %364 = vmatprep.mubr.msk.bf16.mxu1 %vm94_vm0, %v384_v4  ;;  %v390_v11 = vld [vmem:[%s548_s0 + $0x38] sm:$0xff]   ;;  %v465_v14 = vld [vmem:[%s550_s3] ss:$0 sm:$0xff] }
   0x7   :  { %353 = vmatpush3.bf16.msra.mxu0 %v381_v1  ;;  %376 = vmatpush3.bf16.msra.mxu1 %v381_v1 }
   0x8   :  { %378 = vmatprep.subr.msk.bf16.mxu0 %vm119_vm1, %v382_v2  ;;  %379 = vmatprep.subr.msk.bf16.mxu1 %vm119_vm1, %v382_v2 }
   0xb   :  { %355 = vmatpush3.bf16.msra.mxu0 %v121_v5  ;;  %377 = vmatpush3.bf16.msra.mxu1 %v121_v5 }
   0xe   :  { %357 = vmatmul.mubr.msk.bf16.vlgmr.msra.gmra.mrb[0].mxu0 %vm94_vm0, %v385_v6  ;;  %365 = vmatmul.mubr.msk.bf16.vlgmr.msra.gmra.mrb[0].mxu1 %vm94_vm0, %v386_v7 }
   0xf   :  { %360 = vmatprep.mubr.msk.bf16.mxu0 %vm94_vm0, %v387_v8  ;;  %368 = vmatprep.mubr.msk.bf16.mxu1 %vm94_vm0, %v388_v9 }
  0x16   :  { %361 = vmatmul.mubr.msk.bf16.gmra.mrb[4].mxu0 %vm94_vm0, %v389_v10  ;;  %369 = vmatmul.mubr.msk.bf16.gmra.mrb[4].mxu1 %vm94_vm0, %v390_v11 }
  0xe1   :  { %v358_v13 = vpop.f32.mrb[0].mxu0  ;;  %v366_v15 = vpop.f32.mrb[0].mxu1 }
  0xe2   :  { %v229_v16 = vmul.f32 %v358_v13, %v460_v12  ;;  %v237_v17 = vmul.f32 %v366_v15, %v460_v12  ;;  %v157_v18 = vpop.f32.mrb[1].mxu0  ;;  %v189_v19 = vpop.f32.mrb[1].mxu1 }
  0xe3   :  { %v227_v20 = vmul.f32 %v460_v12, %v157_v18  ;;  %v235_v21 = vmul.f32 %v460_v12, %v189_v19  ;;  %v359_v22 = vpop.f32.mrb[2].mxu0  ;;  %v367_v23 = vpop.f32.mrb[2].mxu1 }
  0xe4   :  { %v252_v24 = vadd.f32 %v465_v14, %v229_v16  ;;  %v260_v25 = vadd.f32 %v465_v14, %v237_v17  ;;  %v230_v26 = vmul.f32 %v359_v22, %v460_v12  ;;  %v238_v27 = vmul.f32 %v367_v23, %v460_v12  ;;  %v160_v28 = vpop.f32.mrb[3].mxu0  ;;  %v192_v29 = vpop.f32.mrb[3].mxu1 }
  0xe5   :  { %v250_v30 = vadd.f32 %v465_v14, %v227_v20  ;;  %v258_v31 = vadd.f32 %v465_v14, %v235_v21  ;;  %v228_v32 = vmul.f32 %v460_v12, %v160_v28  ;;  %v236_v33 = vmul.f32 %v460_v12, %v192_v29 }
  0xe6   :  { %v268_v34 = vmul.f32 0.1, %v252_v24  ;;  %v276_v35 = vmul.f32 0.1, %v260_v25  ;;  %v253_v36 = vadd.f32 %v465_v14, %v230_v26  ;;  %v261_v37 = vadd.f32 %v465_v14, %v238_v27 }
  0xe7   :  { %v266_v38 = vmul.f32 0.1, %v250_v30  ;;  %v274_v39 = vmul.f32 0.1, %v258_v31  ;;  %v251_v40 = vadd.f32 %v465_v14, %v228_v32  ;;  %v259_v41 = vadd.f32 %v465_v14, %v236_v33 }
  0xe8   :  { %v284_v42 = vmax.f32 %v252_v24, %v268_v34  ;;  %v292_v43 = vmax.f32 %v260_v25, %v276_v35  ;;  %v269_v44 = vmul.f32 0.1, %v253_v36  ;;  %v277_v45 = vmul.f32 0.1, %v261_v37 }
  0xe9   :  { %v282_v46 = vmax.f32 %v250_v30, %v266_v38  ;;  %v290_v47 = vmax.f32 %v258_v31, %v274_v39  ;;  %v267_v48 = vmul.f32 0.1, %v251_v40  ;;  %v275_v49 = vmul.f32 0.1, %v259_v41  ;;  %v362_v50 = vpop.f32.mrb[4].mxu0  ;;  %v370_v51 = vpop.f32.mrb[4].mxu1 }
  0xea   :  { %300 = vst [vmem:[%s551_s4 + $0x10] sm:$0xff] %v284_v42  ;;  %308 = vst [vmem:[%s551_s4 + $0x50] sm:$0xff] %v292_v43  ;;  %v285_v52 = vmax.f32 %v253_v36, %v269_v44  ;;  %v293_v53 = vmax.f32 %v261_v37, %v277_v45  ;;  %v233_v54 = vmul.f32 %v362_v50, %v460_v12  ;;  %v173_v56 = vpop.f32.mrb[5].mxu0  ;;  %v205_v57 = vpop.f32.mrb[5].mxu1 }
  0xeb   :  { %v241_v55 = vmul.f32 %v370_v51, %v460_v12  ;;  %298 = vst [vmem:[%s551_s4] sm:$0xff] %v282_v46  ;;  %306 = vst [vmem:[%s551_s4 + $0x40] sm:$0xff] %v290_v47  ;;  %v283_v58 = vmax.f32 %v251_v40, %v267_v48  ;;  %v291_v59 = vmax.f32 %v259_v41, %v275_v49  ;;  %v363_v62 = vpop.f32.mrb[6].mxu0  ;;  %v371_v63 = vpop.f32.mrb[6].mxu1 }
  0xec   :  { %v231_v60 = vmul.f32 %v460_v12, %v173_v56  ;;  %v239_v61 = vmul.f32 %v460_v12, %v205_v57  ;;  %301 = vst [vmem:[%s551_s4 + $0x18] sm:$0xff] %v285_v52  ;;  %309 = vst [vmem:[%s551_s4 + $0x58] sm:$0xff] %v293_v53  ;;  %v256_v0 = vadd.f32 %v465_v14, %v233_v54  ;;  %v176_v4 = vpop.f32.mrb[7].mxu0  ;;  %v208_v5 = vpop.f32.mrb[7].mxu1 }
  0xed   :  { %v264_v1 = vadd.f32 %v465_v14, %v241_v55  ;;  %v234_v2 = vmul.f32 %v363_v62, %v460_v12  ;;  %v242_v3 = vmul.f32 %v371_v63, %v460_v12  ;;  %299 = vst [vmem:[%s551_s4 + $0x8] sm:$0xff] %v283_v58  ;;  %307 = vst [vmem:[%s551_s4 + $0x48] sm:$0xff] %v291_v59 }
  0xee   :  { %v254_v6 = vadd.f32 %v465_v14, %v231_v60  ;;  %v262_v7 = vadd.f32 %v465_v14, %v239_v61  ;;  %v232_v8 = vmul.f32 %v460_v12, %v176_v4  ;;  %v240_v9 = vmul.f32 %v460_v12, %v208_v5 }
  0xef   :  { %v272_v10 = vmul.f32 0.1, %v256_v0  ;;  %v280_v11 = vmul.f32 0.1, %v264_v1  ;;  %v257_v13 = vadd.f32 %v465_v14, %v234_v2  ;;  %v265_v15 = vadd.f32 %v465_v14, %v242_v3 }
  0xf0   :  { %v270_v16 = vmul.f32 0.1, %v254_v6  ;;  %v278_v17 = vmul.f32 0.1, %v262_v7  ;;  %v255_v18 = vadd.f32 %v465_v14, %v232_v8  ;;  %v263_v19 = vadd.f32 %v465_v14, %v240_v9 }
  0xf1   :  { %v288_v20 = vmax.f32 %v256_v0, %v272_v10  ;;  %v296_v21 = vmax.f32 %v264_v1, %v280_v11  ;;  %v273_v22 = vmul.f32 0.1, %v257_v13  ;;  %v281_v23 = vmul.f32 0.1, %v265_v15 }
  0xf2   :  { %v286_v24 = vmax.f32 %v254_v6, %v270_v16  ;;  %v294_v25 = vmax.f32 %v262_v7, %v278_v17  ;;  %v271_v26 = vmul.f32 0.1, %v255_v18  ;;  %v279_v12 = vmul.f32 0.1, %v263_v19 }
  0xf3   :  { %304 = vst [vmem:[%s551_s4 + $0x30] sm:$0xff] %v288_v20  ;;  %312 = vst [vmem:[%s551_s4 + $0x70] sm:$0xff] %v296_v21  ;;  %v289_v27 = vmax.f32 %v257_v13, %v273_v22  ;;  %v297_v28 = vmax.f32 %v265_v15, %v281_v23 }
  0xf4   :  { %302 = vst [vmem:[%s551_s4 + $0x20] sm:$0xff] %v286_v24  ;;  %310 = vst [vmem:[%s551_s4 + $0x60] sm:$0xff] %v294_v25  ;;  %v287_v14 = vmax.f32 %v255_v18, %v271_v26  ;;  %v295_v29 = vmax.f32 %v263_v19, %v279_v12 }
  0xf5   :  { %305 = vst [vmem:[%s551_s4 + $0x38] sm:$0xff] %v289_v27  ;;  %313 = vst [vmem:[%s551_s4 + $0x78] sm:$0xff] %v297_v28 }
  0xf6   :  { %303 = vst [vmem:[%s551_s4 + $0x28] sm:$0xff] %v287_v14  ;;  %311 = vst [vmem:[%s551_s4 + $0x68] sm:$0xff] %v295_v29 }

</bundles_post_ra>
